<compile_context>
chip_gen: v6e
topology: v6e:2x2x1
jax: 0.10.0
libtpu: 0.0.40
codegen_flags: <defaults>
</compile_context>

<pallas_src>
import functools

import jax
import jax.numpy as jnp
from jax.experimental import pallas as pl
from jax.experimental.pallas import tpu as pltpu

_LANE = 128
_SUBLANE = 8


def _round_up(x, m):
    return ((x + m - 1) // m) * m


# ----------------------------------------------------------------------------
# Kernels
# ----------------------------------------------------------------------------
def _renorm_train_kernel(x_ref, gamma_ref, beta_ref, ra_mean_ref, ra_var_ref,
                         y_ref, new_mean_ref, new_var_ref,
                         *, eps, r_max, d_max, momentum, n):
    x = x_ref[...].astype(jnp.float32)                     # (N, TILE_C)

    # Batch stats along dim 0; unbiased variance (torch.var_mean defaults).
    mean = jnp.mean(x, axis=0, keepdims=True)              # (1, TILE_C)
    diff = x - mean
    var = jnp.sum(diff * diff, axis=0, keepdims=True) * (1.0 / (n - 1))

    ra_mean = ra_mean_ref[...].astype(jnp.float32)
    ra_var = ra_var_ref[...].astype(jnp.float32)
    gamma = gamma_ref[...].astype(jnp.float32)
    beta = beta_ref[...].astype(jnp.float32)

    # rsqrt -> EUP (separate bundle slot); avoid per-element divides entirely.
    inv_std = jax.lax.rsqrt(var + eps)                     # 1 / sqrt(var + eps)
    inv_ra_std = jax.lax.rsqrt(ra_var + eps)
    std = (var + eps) * inv_std                            # == sqrt(var + eps)

    r = jnp.clip(std * inv_ra_std, 1.0 / r_max, r_max)
    d = jnp.clip((mean - ra_mean) * inv_ra_std, -d_max, d_max)

    # y = gamma * ((x - mean) * r / std + d) + beta  ==  x * scale + shift
    scale = gamma * r * inv_std                            # (1, TILE_C)
    shift = beta + gamma * d - mean * scale                # (1, TILE_C)
    y_ref[...] = (x * scale + shift).astype(y_ref.dtype)

    # Running-stat EMA update (returned as new buffers).
    new_mean_ref[...] = (momentum * ra_mean +
                         (1.0 - momentum) * mean).astype(new_mean_ref.dtype)
    new_var_ref[...] = (momentum * ra_var +
                        (1.0 - momentum) * var).astype(new_var_ref.dtype)


def _renorm_eval_kernel(x_ref, gamma_ref, beta_ref, ra_mean_ref, ra_var_ref,
                        y_ref, *, eps):
    inv_std = jax.lax.rsqrt(ra_var_ref[...].astype(jnp.float32) + eps)
    scale = gamma_ref[...].astype(jnp.float32) * inv_std
    shift = (beta_ref[...].astype(jnp.float32)
             - ra_mean_ref[...].astype(jnp.float32) * scale)
    x = x_ref[...].astype(jnp.float32)
    y_ref[...] = (x * scale + shift).astype(y_ref.dtype)


# ----------------------------------------------------------------------------
# Wrappers
# ----------------------------------------------------------------------------
def batch_renorm_train(x, gamma, beta, ra_mean, ra_var, momentum,
                       *, eps=1e-5, r_max=3.0, d_max=5.0,
                       max_block_bytes=4 * 1024 * 1024):
    """Training-mode forward. x: (N, C). Returns (y, new_ra_mean, new_ra_var)."""
    n, c = x.shape
    if n < 2:
        raise ValueError("BatchRenorm training mode needs N >= 2 "
                         "(unbiased variance divides by N-1).")

    # Largest lane-dense feature tile (multiple of 128) whose (N, TILE_C) f32
    # x-block stays under max_block_bytes (keeps double-buffered working set
    # well inside scoped VMEM on v5e/v6e/v7x).
    max_tc = max(_LANE, (max_block_bytes // (n * 4)) // _LANE * _LANE)
    c_pad = _round_up(c, _LANE)
    tile_c = min(max_tc, c_pad)
    c_pad = _round_up(c, tile_c)
    grid = (c_pad // tile_c,)

    def pad_c(a, value):
        if a.shape[-1] == c_pad:
            return a
        return jnp.pad(a, ((0, 0), (0, c_pad - c)), constant_values=value)

    xp = pad_c(x, 0.0)
    gp = pad_c(gamma, 1.0)
    bp = pad_c(beta, 0.0)
    rmp = pad_c(ra_mean, 0.0)
    rvp = pad_c(ra_var, 1.0)

    kernel = functools.partial(
        _renorm_train_kernel, eps=float(eps), r_max=float(r_max),
        d_max=float(d_max), momentum=float(momentum), n=n)

    row_spec = pl.BlockSpec((n, tile_c), lambda j: (0, j))
    vec_spec = pl.BlockSpec((1, tile_c), lambda j: (0, j))

    y, new_mean, new_var = pl.pallas_call(
        kernel,
        out_shape=(
            jax.ShapeDtypeStruct((n, c_pad), x.dtype),
            jax.ShapeDtypeStruct((1, c_pad), jnp.float32),
            jax.ShapeDtypeStruct((1, c_pad), jnp.float32),
        ),
        grid=grid,
        in_specs=[row_spec, vec_spec, vec_spec, vec_spec, vec_spec],
        out_specs=(row_spec, vec_spec, vec_spec),
        compiler_params=pltpu.CompilerParams(
            dimension_semantics=("parallel",)),
    )(xp, gp, bp, rmp, rvp)

    return y[:, :c], new_mean[:, :c], new_var[:, :c]


def batch_renorm_eval(x, gamma, beta, ra_mean, ra_var, *, eps=1e-5,
                      max_block_bytes=4 * 1024 * 1024):
    """Eval-mode forward. x: (N, C). Returns y."""
    n, c = x.shape

    tile_n = min(_round_up(n, _SUBLANE), 512)
    n_pad = _round_up(n, tile_n)
    max_tc = max(_LANE, (max_block_bytes // (tile_n * 4)) // _LANE * _LANE)
    c_pad = _round_up(c, _LANE)
    tile_c = min(max_tc, c_pad)
    c_pad = _round_up(c, tile_c)
    grid = (n_pad // tile_n, c_pad // tile_c)

    def pad2(a, value, rows):
        pr = rows - a.shape[0]
        pc = c_pad - a.shape[1]
        if pr == 0 and pc == 0:
            return a
        return jnp.pad(a, ((0, pr), (0, pc)), constant_values=value)

    xp = pad2(x, 0.0, n_pad)
    gp = pad2(gamma, 1.0, 1)
    bp = pad2(beta, 0.0, 1)
    rmp = pad2(ra_mean, 0.0, 1)
    rvp = pad2(ra_var, 1.0, 1)

    kernel = functools.partial(_renorm_eval_kernel, eps=float(eps))

    xy_spec = pl.BlockSpec((tile_n, tile_c), lambda i, j: (i, j))
    vec_spec = pl.BlockSpec((1, tile_c), lambda i, j: (0, j))

    y = pl.pallas_call(
        kernel,
        out_shape=jax.ShapeDtypeStruct((n_pad, c_pad), x.dtype),
        grid=grid,
        in_specs=[xy_spec, vec_spec, vec_spec, vec_spec, vec_spec],
        out_specs=xy_spec,
        compiler_params=pltpu.CompilerParams(
            dimension_semantics=("parallel", "parallel")),
    )(xp, gp, bp, rmp, rvp)

    return y[:n, :c]


# ----------------------------------------------------------------------------
# Demo / correctness check
# ----------------------------------------------------------------------------
if __name__ == "__main__":
    key = jax.random.PRNGKey(0)

    N, C = 8, 32          # batch=8 (sublanes), num_features=32 (lanes)
    eps = 1e-5
    momentum = 0.995

    x = jax.random.normal(key, (N, C), dtype=jnp.float32) * 2.0 + 0.5

    # Deterministic parameter / buffer init matching the module's __init__.
    gamma = jnp.ones((1, C), jnp.float32)
    beta = jnp.zeros((1, C), jnp.float32)
    ra_mean = jnp.zeros((1, C), jnp.float32)
    ra_var = jnp.ones((1, C), jnp.float32)

    # Training-mode forward (branch under self.training + grad enabled).
    y, new_ra_mean, new_ra_var = batch_renorm_train(
        x, gamma, beta, ra_mean, ra_var, momentum, eps=eps)
    jax.block_until_ready((y, new_ra_mean, new_ra_var))

    # Eval-mode forward with the (original) running stats.
    y_eval = batch_renorm_eval(x, gamma, beta, ra_mean, ra_var, eps=eps)
    jax.block_until_ready(y_eval)

    # Pure-JAX reference (mirrors the PyTorch module's math).
    mean_ref = jnp.mean(x, axis=0, keepdims=True)
    var_ref = jnp.var(x, axis=0, keepdims=True, ddof=1)
    std_ref = jnp.sqrt(var_ref + eps)
    ra_std_ref = jnp.sqrt(ra_var + eps)
    r_ref = jnp.clip(std_ref / ra_std_ref, 1.0 / 3.0, 3.0)
    d_ref = jnp.clip((mean_ref - ra_mean) / ra_std_ref, -5.0, 5.0)
    y_ref = gamma * ((x - mean_ref) * r_ref / std_ref + d_ref) + beta
    assert jnp.allclose(y, y_ref, atol=1e-4, rtol=1e-4)
    assert jnp.allclose(new_ra_mean,
                        momentum * ra_mean + (1 - momentum) * mean_ref,
                        atol=1e-5)
    assert jnp.allclose(new_ra_var,
                        momentum * ra_var + (1 - momentum) * var_ref,
                        atol=1e-5)
    y_eval_ref = gamma * (x - ra_mean) / jnp.sqrt(ra_var + eps) + beta
    assert jnp.allclose(y_eval, y_eval_ref, atol=1e-4, rtol=1e-4)

    print("KERNEL_OK")
</pallas_src>

<mosaic_0001>
module attributes {stable_mosaic.version = 11 : i64} {
  func.func @_renorm_train_kernel(%arg0: i32, %arg1: memref<8x128xf32, #tpu.memory_space<vmem>>, %arg2: memref<1x128xf32, #tpu.memory_space<vmem>>, %arg3: memref<1x128xf32, #tpu.memory_space<vmem>>, %arg4: memref<1x128xf32, #tpu.memory_space<vmem>>, %arg5: memref<1x128xf32, #tpu.memory_space<vmem>>, %arg6: memref<8x128xf32, #tpu.memory_space<vmem>>, %arg7: memref<1x128xf32, #tpu.memory_space<vmem>>, %arg8: memref<1x128xf32, #tpu.memory_space<vmem>>) attributes {dimension_semantics = [#tpu.dimension_semantics<parallel>], iteration_bounds = array<i64: 1>, scalar_prefetch = 0 : i64, scratch_operands = 0 : i64, tpu.core_type = #tpu.core_type<tc>, window_params = [{transform_indices = @transform_0, window_bounds = array<i64: 8, 128>}, {transform_indices = @transform_1, window_bounds = array<i64: 1, 128>}, {transform_indices = @transform_2, window_bounds = array<i64: 1, 128>}, {transform_indices = @transform_3, window_bounds = array<i64: 1, 128>}, {transform_indices = @transform_4, window_bounds = array<i64: 1, 128>}, {transform_indices = @transform_5, window_bounds = array<i64: 8, 128>}, {transform_indices = @transform_6, window_bounds = array<i64: 1, 128>}, {transform_indices = @transform_7, window_bounds = array<i64: 1, 128>}]} {
    %c0 = arith.constant 0 : index
    %c0_0 = arith.constant 0 : index
    %0 = vector.load %arg1[%c0, %c0_0] : memref<8x128xf32, #tpu.memory_space<vmem>>, vector<8x128xf32>
    %cst = arith.constant dense<0.000000e+00> : vector<128xf32>
    %1 = vector.multi_reduction <add>, %0, %cst [0] : vector<8x128xf32> to vector<128xf32>
    %2 = vector.shape_cast %1 : vector<128xf32> to vector<1x128xf32>
    %cst_1 = arith.constant 8.000000e+00 : f32
    %3 = vector.broadcast %cst_1 : f32 to vector<1x128xf32>
    %4 = arith.divf %2, %3 : vector<1x128xf32>
    %5 = vector.broadcast %4 : vector<1x128xf32> to vector<8x128xf32>
    %6 = arith.subf %0, %5 : vector<8x128xf32>
    %7 = arith.mulf %6, %6 : vector<8x128xf32>
    %cst_2 = arith.constant dense<0.000000e+00> : vector<128xf32>
    %8 = vector.multi_reduction <add>, %7, %cst_2 [0] : vector<8x128xf32> to vector<128xf32>
    %9 = vector.shape_cast %8 : vector<128xf32> to vector<1x128xf32>
    %cst_3 = arith.constant 0.142857149 : f32
    %10 = vector.broadcast %cst_3 : f32 to vector<1x128xf32>
    %11 = arith.mulf %9, %10 : vector<1x128xf32>
    %c0_4 = arith.constant 0 : index
    %c0_5 = arith.constant 0 : index
    %12 = vector.load %arg4[%c0_4, %c0_5] : memref<1x128xf32, #tpu.memory_space<vmem>>, vector<1x128xf32>
    %c0_6 = arith.constant 0 : index
    %c0_7 = arith.constant 0 : index
    %13 = vector.load %arg5[%c0_6, %c0_7] : memref<1x128xf32, #tpu.memory_space<vmem>>, vector<1x128xf32>
    %c0_8 = arith.constant 0 : index
    %c0_9 = arith.constant 0 : index
    %14 = vector.load %arg2[%c0_8, %c0_9] : memref<1x128xf32, #tpu.memory_space<vmem>>, vector<1x128xf32>
    %c0_10 = arith.constant 0 : index
    %c0_11 = arith.constant 0 : index
    %15 = vector.load %arg3[%c0_10, %c0_11] : memref<1x128xf32, #tpu.memory_space<vmem>>, vector<1x128xf32>
    %cst_12 = arith.constant 9.99999974E-6 : f32
    %16 = vector.broadcast %cst_12 : f32 to vector<1x128xf32>
    %17 = arith.addf %11, %16 : vector<1x128xf32>
    %18 = math.rsqrt %17 : vector<1x128xf32>
    %cst_13 = arith.constant 9.99999974E-6 : f32
    %19 = vector.broadcast %cst_13 : f32 to vector<1x128xf32>
    %20 = arith.addf %13, %19 : vector<1x128xf32>
    %21 = math.rsqrt %20 : vector<1x128xf32>
    %cst_14 = arith.constant 9.99999974E-6 : f32
    %22 = vector.broadcast %cst_14 : f32 to vector<1x128xf32>
    %23 = arith.addf %11, %22 : vector<1x128xf32>
    %24 = arith.mulf %23, %18 : vector<1x128xf32>
    %25 = arith.mulf %24, %21 : vector<1x128xf32>
    %cst_15 = arith.constant 0.333333343 : f32
    %cst_16 = arith.constant 3.000000e+00 : f32
    %26 = vector.broadcast %cst_15 : f32 to vector<1x128xf32>
    %27 = arith.maximumf %26, %25 : vector<1x128xf32>
    %28 = vector.broadcast %cst_16 : f32 to vector<1x128xf32>
    %29 = arith.minimumf %28, %27 : vector<1x128xf32>
    %30 = arith.subf %4, %12 : vector<1x128xf32>
    %31 = arith.mulf %30, %21 : vector<1x128xf32>
    %cst_17 = arith.constant -5.000000e+00 : f32
    %cst_18 = arith.constant 5.000000e+00 : f32
    %32 = vector.broadcast %cst_17 : f32 to vector<1x128xf32>
    %33 = arith.maximumf %32, %31 : vector<1x128xf32>
    %34 = vector.broadcast %cst_18 : f32 to vector<1x128xf32>
    %35 = arith.minimumf %34, %33 : vector<1x128xf32>
    %36 = arith.mulf %14, %29 : vector<1x128xf32>
    %37 = arith.mulf %36, %18 : vector<1x128xf32>
    %38 = arith.mulf %14, %35 : vector<1x128xf32>
    %39 = arith.addf %15, %38 : vector<1x128xf32>
    %40 = arith.mulf %4, %37 : vector<1x128xf32>
    %41 = arith.subf %39, %40 : vector<1x128xf32>
    %42 = vector.broadcast %37 : vector<1x128xf32> to vector<8x128xf32>
    %43 = arith.mulf %0, %42 : vector<8x128xf32>
    %44 = vector.broadcast %41 : vector<1x128xf32> to vector<8x128xf32>
    %45 = arith.addf %43, %44 : vector<8x128xf32>
    %c0_19 = arith.constant 0 : index
    %c0_20 = arith.constant 0 : index
    %46 = vector.load %arg6[%c0_19, %c0_20] : memref<8x128xf32, #tpu.memory_space<vmem>>, vector<8x128xf32>
    tpu.vector_store %arg6[%c0_19, %c0_20], %45 {strides = array<i32>} : memref<8x128xf32, #tpu.memory_space<vmem>>, vector<8x128xf32>,
    %cst_21 = arith.constant 9.950000e-01 : f32
    %47 = vector.broadcast %cst_21 : f32 to vector<1x128xf32>
    %48 = arith.mulf %47, %12 : vector<1x128xf32>
    %cst_22 = arith.constant 5.000000e-03 : f32
    %49 = vector.broadcast %cst_22 : f32 to vector<1x128xf32>
    %50 = arith.mulf %49, %4 : vector<1x128xf32>
    %51 = arith.addf %48, %50 : vector<1x128xf32>
    %c0_23 = arith.constant 0 : index
    %c0_24 = arith.constant 0 : index
    %52 = vector.load %arg7[%c0_23, %c0_24] : memref<1x128xf32, #tpu.memory_space<vmem>>, vector<1x128xf32>
    tpu.vector_store %arg7[%c0_23, %c0_24], %51 {strides = array<i32>} : memref<1x128xf32, #tpu.memory_space<vmem>>, vector<1x128xf32>,
    %cst_25 = arith.constant 9.950000e-01 : f32
    %53 = vector.broadcast %cst_25 : f32 to vector<1x128xf32>
    %54 = arith.mulf %53, %13 : vector<1x128xf32>
    %cst_26 = arith.constant 5.000000e-03 : f32
    %55 = vector.broadcast %cst_26 : f32 to vector<1x128xf32>
    %56 = arith.mulf %55, %11 : vector<1x128xf32>
    %57 = arith.addf %54, %56 : vector<1x128xf32>
    %c0_27 = arith.constant 0 : index
    %c0_28 = arith.constant 0 : index
    %58 = vector.load %arg8[%c0_27, %c0_28] : memref<1x128xf32, #tpu.memory_space<vmem>>, vector<1x128xf32>
    tpu.vector_store %arg8[%c0_27, %c0_28], %57 {strides = array<i32>} : memref<1x128xf32, #tpu.memory_space<vmem>>, vector<1x128xf32>,
    return
  }
  func.func @transform_0(%arg0: i32) -> (i32, i32) {
    %c0_i32 = arith.constant 0 : i32
    %c0_i32_0 = arith.constant 0 : i32
    return %c0_i32, %arg0 : i32, i32
  }
  func.func @transform_1(%arg0: i32) -> (i32, i32) {
    %c0_i32 = arith.constant 0 : i32
    %c0_i32_0 = arith.constant 0 : i32
    return %c0_i32, %arg0 : i32, i32
  }
  func.func @transform_2(%arg0: i32) -> (i32, i32) {
    %c0_i32 = arith.constant 0 : i32
    %c0_i32_0 = arith.constant 0 : i32
    return %c0_i32, %arg0 : i32, i32
  }
  func.func @transform_3(%arg0: i32) -> (i32, i32) {
    %c0_i32 = arith.constant 0 : i32
    %c0_i32_0 = arith.constant 0 : i32
    return %c0_i32, %arg0 : i32, i32
  }
  func.func @transform_4(%arg0: i32) -> (i32, i32) {
    %c0_i32 = arith.constant 0 : i32
    %c0_i32_0 = arith.constant 0 : i32
    return %c0_i32, %arg0 : i32, i32
  }
  func.func @transform_5(%arg0: i32) -> (i32, i32) {
    %c0_i32 = arith.constant 0 : i32
    %c0_i32_0 = arith.constant 0 : i32
    return %c0_i32, %arg0 : i32, i32
  }
  func.func @transform_6(%arg0: i32) -> (i32, i32) {
    %c0_i32 = arith.constant 0 : i32
    %c0_i32_0 = arith.constant 0 : i32
    return %c0_i32, %arg0 : i32, i32
  }
  func.func @transform_7(%arg0: i32) -> (i32, i32) {
    %c0_i32 = arith.constant 0 : i32
    %c0_i32_0 = arith.constant 0 : i32
    return %c0_i32, %arg0 : i32, i32
  }
}

</mosaic_0001>

<bundles_post_ra>
// kernel: tpu_custom_call.1
= control target key start
LH: loop header
LB: loop body
LE: loop exit
PB: predicated region body
PF: predicated region fallthrough
CT: control target
= control target key end

     0   :  { %13 = vsyncpa [#allocation3], 0  ;;  %s317_s0 = inlined_call_operand.hbm [shape: f32[8,128], index: 0, kind: input, shape index: {}]   ;;  %s318_s1 = inlined_call_operand.vmem [shape: f32[1,128], index: 1, kind: input, shape index: {}]   ;;  %s319_s2 = inlined_call_operand.vmem [shape: f32[1,128], index: 2, kind: input, shape index: {}]   ;;  %s320_s3 = inlined_call_operand.vmem [shape: f32[1,128], index: 3, kind: input, shape index: {}]   ;;  %s321_s4 = inlined_call_operand.vmem [shape: f32[1,128], index: 4, kind: input, shape index: {}]   ;;  %s322_s5 = inlined_call_operand.hbm [shape: f32[8,128], index: 5, kind: output, shape index: {0}]   ;;  %s323_s6 = inlined_call_operand.hbm [shape: f32[1,128], index: 6, kind: output, shape index: {1}]   ;;  %s324_s7 = inlined_call_operand.hbm [shape: f32[1,128], index: 7, kind: output, shape index: {2}]  }
   0x1   :  { %14 = vsyncpa [#allocation4], 0 }
   0x2   :  { %15 = vsyncpa [#allocation7], 0  ;;  %s237_s24 = smov [#allocation2]  }
   0x3   :  { %s22_s25 = sshll.u32 %s237_s24, 4  ;;  %s23_s25 = int_to_ptr.vmem [resolvable:$true] %s22_s25 }
   0x4   :  { %s159_s26 = scalar_lea.vmem %s23_s25, 128  ;;  %p164_p1 = scmp.lt.s32.totalorder %s23_s25, %s23_s25 }
   0x5   :  { %p160_p0 = scmp.ne.s32.totalorder %s23_s25, %s159_s26  ;;  %p165_p2 = scmp.lt.s32.totalorder %s159_s26, %s159_s26 }
   0x7   :  { %p166_p3 = por %p165_p2, %p164_p1 }
   0x9   :  { %p167_p4 = pnand %p166_p3, %p160_p0 }
   0xb   :  { %170 = shalt.err (!%p167_p4)
}
   0xc   :  { %25 = dma.hbm_to_vmem [thread:$0]  %s317_s0, 128, %s23_s25, [#allocation3]  }
   0xd   :  { %231 = dma.done.wait [#allocation3], 128  }
   0xe   :  { %232 = vsyncadd [#allocation3], 4294967168  ;;  %v284_v0 = vld [vmem:[#allocation2] sm:$0xff]  ;;  %s238_s0 = smov [#allocation6]  }
   0xf   :  { %v38_v1 = vrot.slane %v284_v0, 4  ;;  %v55_v7 = vld [vmem:[%s320_s3] sm:$0x1]  ;;  %s116_s8 = sshll.u32 %s238_s0, 4  ;;  %s117_s8 = int_to_ptr.vmem [resolvable:$true] %s116_s8 }
  0x10   :  { %v92_v9 = vmul.f32 0.995, %v55_v7  ;;  %s171_s9 = scalar_lea.vmem %s117_s8, 16  ;;  %s175_s10 = scalar_lea.vmem %s117_s8, 32 }
  0x11   :  { %v39_v2 = vadd.f32 %v38_v1, %v284_v0  ;;  %p172_p5 = scmp.ne.s32.totalorder %s117_s8, %s171_s9  ;;  %p176_p6 = scmp.lt.s32.totalorder %s117_s8, %s117_s8 }
  0x12   :  { %p177_p7 = scmp.lt.s32.totalorder %s175_s10, %s171_s9 }
  0x13   :  { %v40_v3 = vrot.slane %v39_v2, 2 }
  0x14   :  { %p178_p8 = por %p177_p7, %p176_p6 }
  0x15   :  { %v41_v4 = vadd.f32 %v40_v3, %v39_v2 }
  0x16   :  { %p179_p9 = pnand %p178_p8, %p172_p5 }
  0x17   :  { %v42_v5 = vrot.slane %v41_v4, 1 }
  0x19   :  { %v43_v6 = vadd.f32 %v42_v5, %v41_v4 }
  0x1b   :  { %v291_v8 = vmul.f32 0.125, %v43_v6 }
  0x1d   :  { %v46_v10 = vsub.f32 %v284_v0, %v291_v8  ;;  %v93_v11 = vmul.f32 0.005, %v291_v8 }
  0x1f   :  { %v47_v12 = vmul.f32 %v46_v10, %v46_v10  ;;  %v94_v13 = vadd.f32 %v93_v11, %v92_v9 }
  0x21   :  { %v48_v14 = vrot.slane %v47_v12, 4  ;;  %95 = vst [vmem:[#allocation6] sm:$0x1] %v94_v13 }
  0x22   :  { %182 = shalt.err (!%p179_p9)
}
  0x23   :  { %119 = dma.vmem_to_hbm [thread:$0]  %s117_s8, 16, %s323_s6, [#allocation7]   ;;  %v49_v15 = vadd.f32 %v48_v14, %v47_v12  ;;  %v56_v18 = vld [vmem:[%s321_s4] sm:$0x1] }
  0x24   :  { %v61_v20 = vadd.f32 1e-05, %v56_v18  ;;  %v96_v23 = vmul.f32 0.995, %v56_v18  ;;  %s239_s14 = smov [#allocation8]  }
  0x25   :  { %v50_v16 = vrot.slane %v49_v15, 2  ;;  %s126_s15 = sshll.u32 %s239_s14, 4  ;;  %s127_s15 = int_to_ptr.vmem [resolvable:$true] %s126_s15 }
  0x26   :  { %147 = vrsqrt.f32 %v61_v20  ;;  %s191_s6 = scalar_lea.vmem %s127_s15, 16  ;;  %s195_s16 = scalar_lea.vmem %s127_s15, 32 }
  0x27   :  { %v51_v17 = vadd.f32 %v50_v16, %v49_v15  ;;  %p192_p10 = scmp.ne.s32.totalorder %s127_s15, %s191_s6  ;;  %p196_p11 = scmp.lt.s32.totalorder %s127_s15, %s127_s15 }
  0x28   :  { %p197_p12 = scmp.lt.s32.totalorder %s195_s16, %s191_s6 }
  0x29   :  { %v52_v19 = vrot.slane %v51_v17, 1 }
  0x2a   :  { %p198_p13 = por %p197_p12, %p196_p11 }
  0x2b   :  { %v53_v21 = vadd.f32 %v52_v19, %v51_v17 }
  0x2c   :  { %p199_p0 = pnand %p198_p13, %p192_p10 }
  0x2d   :  { %v54_v22 = vmul.f32 0.14285715, %v53_v21 }
  0x2f   :  { %v59_v24 = vadd.f32 1e-05, %v54_v22  ;;  %v97_v25 = vmul.f32 0.005, %v54_v22 }
  0x31   :  { %149 = vrsqrt.f32 %v59_v24  ;;  %v98_v26 = vadd.f32 %v97_v25, %v96_v23 }
  0x33   :  { %99 = vst [vmem:[#allocation8] sm:$0x1] %v98_v26 }
  0x34   :  { %202 = shalt.err (!%p199_p0)
}
  0x35   :  { %129 = dma.vmem_to_hbm [thread:$0]  %s127_s15, 16, %s324_s7, [#allocation7]   ;;  %v67_v27 = vsub.f32 %v291_v8, %v55_v7  ;;  %v148_v28 = vpop.eup %147  ;;  %v78_v32 = vlaneseq  ;;  %v57_v37 = vld [vmem:[%s318_s1] sm:$0x1] }
  0x36   :  { %v58_v40 = vld [vmem:[%s319_s2] sm:$0x1]  ;;  %s240_s7 = smov [#allocation5]  }
  0x37   :  { %v68_v29 = vmul.f32 %v148_v28, %v67_v27  ;;  %v79_v36 = vshrl.u32 %v78_v32, 7  ;;  %s106_s22 = sshll.u32 %s240_s7, 4  ;;  %s107_s22 = int_to_ptr.vmem [resolvable:$true] %s106_s22 }
  0x38   :  { %s211_s1 = scalar_lea.vmem %s107_s22, 128  ;;  %p216_p2 = scmp.lt.s32.totalorder %s107_s22, %s107_s22 }
  0x39   :  { %v142_v33 = vclamps-f32 %v68_v29, 5.0  ;;  %v80_v42 = vsub.s32 0, %v79_v36  ;;  %p212_p1 = scmp.ne.s32.totalorder %s107_s22, %s211_s1  ;;  %p217_p3 = scmp.lt.s32.totalorder %s211_s1, %s211_s1 }
  0x3b   :  { %v73_v39 = vmul.f32 %v142_v33, %v57_v37  ;;  %p218_p4 = por %p217_p3, %p216_p2 }
  0x3d   :  { %v74_v44 = vadd.f32 %v73_v39, %v58_v40  ;;  %p219_p5 = pnand %p218_p4, %p212_p1 }
  0x3e   :  { %v150_v30 = vpop.eup %149 }
  0x3f   :  { %v63_v31 = vmul.f32 %v150_v30, %v59_v24 }
  0x41   :  { %v64_v34 = vmul.f32 %v148_v28, %v63_v31 }
  0x43   :  { %v65_v35 = vmax.f32 %v64_v34, 0.33333334 }
  0x45   :  { %v66_v38 = vmin.f32 %v65_v35, 3.0 }
  0x47   :  { %v71_v41 = vmul.f32 %v66_v38, %v57_v37 }
  0x49   :  { %v72_v43 = vmul.f32 %v150_v30, %v71_v41 }
  0x4b   :  { %v75_v45 = vmul.f32 %v72_v43, %v291_v8  ;;  %v81_v46 = vrot.slane %v72_v43, %v80_v42 }
  0x4d   :  { %v76_v47 = vsub.f32 %v74_v44, %v75_v45  ;;  %v83_v48 = vmul.f32 %v81_v46, %v284_v0 }
  0x4f   :  { %v88_v49 = vrot.slane %v76_v47, %v80_v42 }
  0x51   :  { %v90_v50 = vadd.f32 %v88_v49, %v83_v48 }
  0x53   :  { %91 = vst [vmem:[#allocation5] sm:$0xff] %v90_v50 }
  0x54   :  { %222 = shalt.err (!%p219_p5)
}
  0x55   :  { %109 = dma.vmem_to_hbm [thread:$0]  %s107_s22, 128, %s322_s5, [#allocation4]  }
  0x56   :  { %233 = dma.done.wait [#allocation4], 128  }
  0x57   :  { %234 = vsyncadd [#allocation4], 4294967168 }
  0x58   :  { %235 = dma.done.wait [#allocation7], 32  }
  0x59   :  { %236 = vsyncadd [#allocation7], 4294967264 }
  0x5a   :  { %139 = vsyncpa [#allocation3], 1 }
  0x5b   :  { %140 = vsyncpa [#allocation4], 1 }
  0x5c   :  { %141 = vsyncpa [#allocation7], 1 }

</bundles_post_ra>
